<compile_context>
chip_gen: v6e
topology: v6e:2x2x1
jax: 0.10.0
libtpu: 0.0.40
codegen_flags: <defaults>
</compile_context>

<pallas_src>
import functools
import math

import jax
import jax.numpy as jnp
from jax import lax
from jax.experimental import pallas as pl
from jax.experimental.pallas import tpu as pltpu


# ----------------------------------------------------------------------------
# Pallas kernel: one lane tile (= a whole number of images) per grid step.
# ----------------------------------------------------------------------------
def ghost_kernel(x_ref, w1_ref, b1_ref, wdw_ref, b2_ref, m_ref, out_ref, *, W):
    """
    x_ref   : (Cin,   T)  bf16  input pixels; channels on sublanes, batch*spatial on lanes
    w1_ref  : (Cinit, Cin) bf16 1x1 primary-conv weight (BN1 scale folded in)
    b1_ref  : (Cinit, 1)  f32   folded BN1 shift
    wdw_ref : (Cused, 9)  f32   3x3 depthwise taps (BN2 scale folded, already channel-sliced)
    b2_ref  : (Cused, 1)  f32   folded BN2 shift (channel-sliced)
    m_ref   : (8, T)      f32   per-tap zero-padding masks (precomputed, image-periodic)
    out_ref : (oup,  T)   f32   cat([x1, x2], channel)[:oup]
    """
    T = x_ref.shape[1]
    Cinit = w1_ref.shape[0]
    Cused = wdw_ref.shape[0]

    # --- primary conv: 1x1 pointwise == one lane-dense MXU matmul (bf16 in, f32 acc)
    x1 = jnp.maximum(
        jnp.dot(w1_ref[...], x_ref[...], preferred_element_type=jnp.float32)
        + b1_ref[...],
        0.0,
    )                                                     # (Cinit, T) f32

    # Store x1 immediately: the vst overlaps the depthwise VPU/XLU work below.
    out_ref[:Cinit, :] = x1

    # --- cheap operation: 3x3 depthwise conv (groups == Cinit, ratio == 2).
    # Each tap is a lane roll of the flattened image(s) times a precomputed
    # zero-padding mask: 1 XLU roll + 2 VPU muls + 1 add per tap, nothing else.
    taps = wdw_ref[...]                                   # (Cused, 9)
    masks = m_ref[...]                                    # (8, T)
    xs = x1 if Cused == Cinit else x1[:Cused]             # 1:1 channel map (ratio == 2)

    acc = xs * taps[:, 4:5]                               # center tap (di=0, dj=0)
    k = 0
    for di in (-1, 0, 1):
        for dj in (-1, 0, 1):
            if di == 0 and dj == 0:
                continue
            off = di * W + dj
            t = (di + 1) * 3 + (dj + 1)
            src = pltpu.roll(xs, shift=(-off) % T, axis=1)          # src[p] == xs[p+off]
            acc = acc + (src * masks[k:k + 1, :]) * taps[:, t:t + 1]
            k += 1

    out_ref[Cinit:, :] = jnp.maximum(acc + b2_ref[...], 0.0)        # x2, second sub-store


# ----------------------------------------------------------------------------
# Wrapper helpers (glue).
# ----------------------------------------------------------------------------
def _tap_masks(H, W, imgs_per_tile):
    """(8, imgs_per_tile*H*W) f32 validity masks, one row per non-center tap."""
    HW = H * W
    pos = jnp.arange(HW, dtype=jnp.int32)
    h = pos // W
    w = pos % W
    rows = []
    for di in (-1, 0, 1):
        for dj in (-1, 0, 1):
            if di == 0 and dj == 0:
                continue
            mh = jnp.ones((HW,), jnp.bool_)
            if di < 0:
                mh = h >= -di
            elif di > 0:
                mh = h < H - di
            mw = jnp.ones((HW,), jnp.bool_)
            if dj < 0:
                mw = w >= -dj
            elif dj > 0:
                mw = w < W - dj
            rows.append((mh & mw).astype(jnp.float32))
    m = jnp.stack(rows, axis=0)                          # (8, HW), image-periodic
    return jnp.tile(m, (1, imgs_per_tile))               # (8, T)


def _imgs_per_step(N, in_itemsize, Cin, oup, HW, budget_bytes=8 << 20):
    """Images per grid step: big tiles amortize the ~0.35us/step overhead,
    stay well under VMEM (double-buffered in+out), keep >=2 steps for v7x."""
    per_img = HW * (Cin * in_itemsize + oup * 4)
    b = max(1, min(N, budget_bytes // max(1, 2 * per_img)))
    while b > 1 and (N % b != 0 or N // b < 2):
        b -= 1
    return b


def ghost_module_pallas(x_nchw, kparams, oup, *, mxu_dtype=jnp.bfloat16,
                        imgs_per_step=None):
    N, Cin, H, W = x_nchw.shape
    HW = H * W
    w1, b1 = kparams["w1"], kparams["b1"]
    wdw, b2 = kparams["wdw"], kparams["b2"]
    Cinit = w1.shape[0]
    Cused = oup - Cinit
    assert 0 < Cused <= wdw.shape[0]
    # Only channels that survive the final [:oup] slice do depthwise work.
    wdw = wdw[:Cused]
    b2 = b2[:Cused]

    # Fold the batch onto the lane axis: (N,Cin,H,W) -> (Cin, N*HW).  Pure
    # layout plumbing; every in-kernel op then runs on fully occupied lanes.
    x2d = jnp.transpose(x_nchw.reshape(N, Cin, HW), (1, 0, 2)).reshape(Cin, N * HW)
    x2d = x2d.astype(mxu_dtype)                          # bf16 MXU feed / half the DMA
    w1 = w1.astype(mxu_dtype)

    if imgs_per_step is None:
        imgs_per_step = _imgs_per_step(N, x2d.dtype.itemsize, Cin, oup, HW)
    B = imgs_per_step
    T = B * HW
    if T % 128 != 0 and T != N * HW:     # lane blocks must be 128-multiples (or full width)
        B, T = N, N * HW
    nsteps = (N * HW) // T
    assert nsteps * T == N * HW

    masks = _tap_masks(H, W, B)                          # (8, T), same block every step

    flops = (2 * N * HW * Cin * Cinit                    # 1x1 conv
             + 3 * 9 * N * HW * Cused                    # 3x3 depthwise (mask+tap+add)
             + 2 * N * HW * (Cinit + Cused))             # bias + relu epilogues
    bytes_accessed = (x2d.size * x2d.dtype.itemsize + w1.size * w1.dtype.itemsize
                      + 4 * (N * oup * HW + b1.size + wdw.size + b2.size + masks.size))

    out2d = pl.pallas_call(
        functools.partial(ghost_kernel, W=W),
        out_shape=jax.ShapeDtypeStruct((oup, N * HW), jnp.float32),
        grid=(nsteps,),
        in_specs=[
            pl.BlockSpec((Cin, T), lambda i: (0, i)),       # lane tile of the folded input
            pl.BlockSpec((Cinit, Cin), lambda i: (0, 0)),   # weights: VMEM-resident
            pl.BlockSpec((Cinit, 1), lambda i: (0, 0)),
            pl.BlockSpec((Cused, 9), lambda i: (0, 0)),
            pl.BlockSpec((Cused, 1), lambda i: (0, 0)),
            pl.BlockSpec((8, T), lambda i: (0, 0)),         # hoisted tap masks
        ],
        out_specs=pl.BlockSpec((oup, T), lambda i: (0, i)),
        compiler_params=pltpu.CompilerParams(
            dimension_semantics=("parallel",),   # >=2 steps -> both v7x TCs get work
            vmem_limit_bytes=64 * 1024 * 1024,
        ),
        cost_estimate=pl.CostEstimate(
            flops=flops, transcendentals=0, bytes_accessed=bytes_accessed),
    )(x2d, w1, b1, wdw, b2, masks)

    # (oup, N*HW) -> NCHW: layout plumbing only.
    return jnp.transpose(out2d.reshape(oup, N, HW), (1, 0, 2)).reshape(N, oup, H, W)


# ----------------------------------------------------------------------------
# Deterministic parameter initialization (synthetic weights, eval-mode BN).
# ----------------------------------------------------------------------------
def init_params(key, inp, oup, kernel_size=1, ratio=2, dw_size=3):
    # TODO(synk): only the default config (kernel_size=1, ratio=2, dw_size=3,
    #             stride=1, relu=True) has a kernel path.
    assert kernel_size == 1 and ratio == 2 and dw_size == 3
    init_channels = math.ceil(oup / ratio)
    new_channels = init_channels * (ratio - 1)
    eps = 1e-5
    ks = jax.random.split(key, 10)

    conv1_w = 0.2 * jax.random.normal(ks[0], (init_channels, inp, 1, 1), jnp.float32)
    g1 = 1.0 + 0.1 * jax.random.normal(ks[1], (init_channels,), jnp.float32)
    be1 = 0.1 * jax.random.normal(ks[2], (init_channels,), jnp.float32)
    m1 = 0.1 * jax.random.normal(ks[3], (init_channels,), jnp.float32)
    v1 = jnp.abs(jax.random.normal(ks[4], (init_channels,), jnp.float32)) + 0.5

    dw_w = 0.2 * jax.random.normal(ks[5], (new_channels, 1, dw_size, dw_size), jnp.float32)
    g2 = 1.0 + 0.1 * jax.random.normal(ks[6], (new_channels,), jnp.float32)
    be2 = 0.1 * jax.random.normal(ks[7], (new_channels,), jnp.float32)
    m2 = 0.1 * jax.random.normal(ks[8], (new_channels,), jnp.float32)
    v2 = jnp.abs(jax.random.normal(ks[9], (new_channels,), jnp.float32)) + 0.5

    raw = dict(conv1_w=conv1_w, g1=g1, be1=be1, m1=m1, v1=v1,
               dw_w=dw_w, g2=g2, be2=be2, m2=m2, v2=v2, eps=eps)

    # Fold eval-mode BN into the conv weights (scale) and a per-channel bias:
    # BN(conv_w(x)) == conv_{w*s}(x) + (beta - mean*s),  s = gamma/sqrt(var+eps).
    s1 = g1 / jnp.sqrt(v1 + eps)
    s2 = g2 / jnp.sqrt(v2 + eps)
    kparams = dict(
        w1=conv1_w.reshape(init_channels, inp) * s1[:, None],             # (Cinit, Cin)
        b1=(be1 - m1 * s1).reshape(init_channels, 1),                      # (Cinit, 1)
        wdw=dw_w.reshape(new_channels, dw_size * dw_size) * s2[:, None],   # (Cnew, 9)
        b2=(be2 - m2 * s2).reshape(new_channels, 1),                       # (Cnew, 1)
    )
    return raw, kparams


# ----------------------------------------------------------------------------
# Pure-JAX references.
# ----------------------------------------------------------------------------
def ghost_module_ref(x_nchw, raw, oup):
    """f32 reference reproducing the PyTorch forward exactly (eval-mode BN)."""
    eps = raw["eps"]

    def bn(x, g, b, m, v):
        return (x - m[None, :, None, None]) / jnp.sqrt(v[None, :, None, None] + eps) \
               * g[None, :, None, None] + b[None, :, None, None]

    x1 = lax.conv_general_dilated(
        x_nchw, raw["conv1_w"], window_strides=(1, 1), padding=[(0, 0), (0, 0)],
        dimension_numbers=("NCHW", "OIHW", "NCHW"), precision=lax.Precision.HIGHEST)
    x1 = jnp.maximum(bn(x1, raw["g1"], raw["be1"], raw["m1"], raw["v1"]), 0.0)

    Cinit = x1.shape[1]
    x2 = lax.conv_general_dilated(
        x1, raw["dw_w"], window_strides=(1, 1), padding=[(1, 1), (1, 1)],
        dimension_numbers=("NCHW", "OIHW", "NCHW"), feature_group_count=Cinit,
        precision=lax.Precision.HIGHEST)
    x2 = jnp.maximum(bn(x2, raw["g2"], raw["be2"], raw["m2"], raw["v2"]), 0.0)

    out = jnp.concatenate([x1, x2], axis=1)
    return out[:, :oup, :, :]


def ghost_module_folded_ref(x_nchw, kparams, oup, mxu_dtype=jnp.float32):
    """Reference on the folded parameters; optionally rounds the primary-conv
    operands to `mxu_dtype` to mirror the kernel's bf16 MXU feed exactly."""
    w1 = kparams["w1"].astype(mxu_dtype).astype(jnp.float32)
    xq = x_nchw.astype(mxu_dtype).astype(jnp.float32)
    x1 = jnp.einsum("oc,nchw->nohw", w1, xq, precision=lax.Precision.HIGHEST)
    x1 = jnp.maximum(x1 + kparams["b1"].reshape(1, -1, 1, 1), 0.0)
    Cinit = w1.shape[0]
    wdw = kparams["wdw"]
    Cnew = wdw.shape[0]
    x2 = lax.conv_general_dilated(
        x1, wdw.reshape(Cnew, 1, 3, 3), window_strides=(1, 1), padding=[(1, 1), (1, 1)],
        dimension_numbers=("NCHW", "OIHW", "NCHW"), feature_group_count=Cinit,
        precision=lax.Precision.HIGHEST)
    x2 = jnp.maximum(x2 + kparams["b2"].reshape(1, -1, 1, 1), 0.0)
    return jnp.concatenate([x1, x2], axis=1)[:, :oup, :, :]


if __name__ == "__main__":
    key = jax.random.PRNGKey(0)
    k_x, k_p = jax.random.split(key)

    inp, oup = 4, 8
    N, H, W = 2, 16, 16
    x = jax.random.normal(k_x, (N, inp, H, W), jnp.float32)        # NCHW like PyTorch

    raw, kparams = init_params(k_p, inp, oup)

    out = jax.block_until_ready(ghost_module_pallas(x, kparams, oup))
    assert out.shape == (N, oup, H, W), out.shape

    # 1) BN folding is exact (pure f32 vs pure f32, PyTorch-equivalent path).
    ref_raw = ghost_module_ref(x, raw, oup)
    ref_fold = ghost_module_folded_ref(x, kparams, oup)
    assert jnp.allclose(ref_fold, ref_raw, atol=1e-4, rtol=1e-4), \
        float(jnp.max(jnp.abs(ref_fold - ref_raw)))

    # 2) The Pallas kernel matches a reference with the same bf16 MXU operand
    #    rounding at tight tolerance (validates the kernel math itself).
    ref_bf16 = ghost_module_folded_ref(x, kparams, oup, mxu_dtype=jnp.bfloat16)
    err_kernel = float(jnp.max(jnp.abs(out - ref_bf16)))
    assert jnp.allclose(out, ref_bf16, atol=2e-3, rtol=2e-3), err_kernel

    # 3) End-to-end deviation from the pure-f32 module is only the bf16
    #    rounding of the primary-conv operands (gross-error guard).
    err_f32 = float(jnp.max(jnp.abs(out - ref_raw)))
    assert err_f32 < 0.5, err_f32

    print("KERNEL_OK")
</pallas_src>

<mosaic_0001>
module attributes {stable_mosaic.version = 11 : i64} {
  func.func @ghost_kernel(%arg0: i32, %arg1: memref<4x256xbf16, #tpu.memory_space<vmem>>, %arg2: memref<4x4xbf16, #tpu.memory_space<vmem>>, %arg3: memref<4x1xf32, #tpu.memory_space<vmem>>, %arg4: memref<4x9xf32, #tpu.memory_space<vmem>>, %arg5: memref<4x1xf32, #tpu.memory_space<vmem>>, %arg6: memref<8x256xf32, #tpu.memory_space<vmem>>, %arg7: memref<8x256xf32, #tpu.memory_space<vmem>>) attributes {dimension_semantics = [#tpu.dimension_semantics<parallel>], iteration_bounds = array<i64: 2>, scalar_prefetch = 0 : i64, scratch_operands = 0 : i64, tpu.core_type = #tpu.core_type<tc>, window_params = [{transform_indices = @transform_0, window_bounds = array<i64: 4, 256>}, {pipeline_mode = #tpu.pipeline_mode<synchronous>, transform_indices = @transform_1, window_bounds = array<i64: 4, 4>}, {pipeline_mode = #tpu.pipeline_mode<synchronous>, transform_indices = @transform_2, window_bounds = array<i64: 4, 1>}, {pipeline_mode = #tpu.pipeline_mode<synchronous>, transform_indices = @transform_3, window_bounds = array<i64: 4, 9>}, {pipeline_mode = #tpu.pipeline_mode<synchronous>, transform_indices = @transform_4, window_bounds = array<i64: 4, 1>}, {pipeline_mode = #tpu.pipeline_mode<synchronous>, transform_indices = @transform_5, window_bounds = array<i64: 8, 256>}, {transform_indices = @transform_6, window_bounds = array<i64: 8, 256>}]} {
    %c0 = arith.constant 0 : index
    %c0_0 = arith.constant 0 : index
    %0 = vector.load %arg2[%c0, %c0_0] : memref<4x4xbf16, #tpu.memory_space<vmem>>, vector<4x4xbf16>
    %c0_1 = arith.constant 0 : index
    %c0_2 = arith.constant 0 : index
    %1 = vector.load %arg1[%c0_1, %c0_2] : memref<4x256xbf16, #tpu.memory_space<vmem>>, vector<4x256xbf16>
    %cst = arith.constant dense<0.000000e+00> : vector<4x256xf32>
    %2 = tpu.matmul %0, %1, %cst {dimension_numbers = #tpu.dot_dimension_numbers<[1], [0], [0], [1], [0, 0, 1, 1], [], []>} : vector<4x4xbf16>, vector<4x256xbf16>, vector<4x256xf32> -> vector<4x256xf32>
    %c0_3 = arith.constant 0 : index
    %c0_4 = arith.constant 0 : index
    %3 = vector.load %arg3[%c0_3, %c0_4] : memref<4x1xf32, #tpu.memory_space<vmem>>, vector<4x1xf32>
    %4 = vector.broadcast %3 : vector<4x1xf32> to vector<4x256xf32>
    %5 = arith.addf %2, %4 : vector<4x256xf32>
    %cst_5 = arith.constant 0.000000e+00 : f32
    %6 = vector.broadcast %cst_5 : f32 to vector<4x256xf32>
    %7 = arith.maximumf %5, %6 : vector<4x256xf32>
    %c0_6 = arith.constant 0 : index
    %c0_7 = arith.constant 0 : index
    %8 = vector.load %arg7[%c0_6, %c0_7] : memref<8x256xf32, #tpu.memory_space<vmem>>, vector<4x256xf32>
    tpu.vector_store %arg7[%c0_6, %c0_7], %7 {strides = array<i32>} : memref<8x256xf32, #tpu.memory_space<vmem>>, vector<4x256xf32>,
    %c0_8 = arith.constant 0 : index
    %c0_9 = arith.constant 0 : index
    %9 = vector.load %arg4[%c0_8, %c0_9] : memref<4x9xf32, #tpu.memory_space<vmem>>, vector<4x9xf32>
    %c0_10 = arith.constant 0 : index
    %c0_11 = arith.constant 0 : index
    %10 = vector.load %arg6[%c0_10, %c0_11] : memref<8x256xf32, #tpu.memory_space<vmem>>, vector<8x256xf32>
    %11 = vector.extract_strided_slice %9 {offsets = [0, 4], sizes = [4, 1], strides = [1, 1]} : vector<4x9xf32> to vector<4x1xf32>
    %12 = vector.broadcast %11 : vector<4x1xf32> to vector<4x256xf32>
    %13 = arith.mulf %7, %12 : vector<4x256xf32>
    %c17_i32 = arith.constant 17 : i32
    %14 = tpu.dynamic_rotate %7 by %c17_i32 dim 1 : vector<4x256xf32>, i32 -> vector<4x256xf32>
    %15 = vector.extract_strided_slice %10 {offsets = [0, 0], sizes = [1, 256], strides = [1, 1]} : vector<8x256xf32> to vector<1x256xf32>
    %16 = vector.broadcast %15 : vector<1x256xf32> to vector<4x256xf32>
    %17 = arith.mulf %14, %16 : vector<4x256xf32>
    %18 = vector.extract_strided_slice %9 {offsets = [0, 0], sizes = [4, 1], strides = [1, 1]} : vector<4x9xf32> to vector<4x1xf32>
    %19 = vector.broadcast %18 : vector<4x1xf32> to vector<4x256xf32>
    %20 = arith.mulf %17, %19 : vector<4x256xf32>
    %21 = arith.addf %13, %20 : vector<4x256xf32>
    %c16_i32 = arith.constant 16 : i32
    %22 = tpu.dynamic_rotate %7 by %c16_i32 dim 1 : vector<4x256xf32>, i32 -> vector<4x256xf32>
    %23 = vector.extract_strided_slice %10 {offsets = [1, 0], sizes = [1, 256], strides = [1, 1]} : vector<8x256xf32> to vector<1x256xf32>
    %24 = vector.broadcast %23 : vector<1x256xf32> to vector<4x256xf32>
    %25 = arith.mulf %22, %24 : vector<4x256xf32>
    %26 = vector.extract_strided_slice %9 {offsets = [0, 1], sizes = [4, 1], strides = [1, 1]} : vector<4x9xf32> to vector<4x1xf32>
    %27 = vector.broadcast %26 : vector<4x1xf32> to vector<4x256xf32>
    %28 = arith.mulf %25, %27 : vector<4x256xf32>
    %29 = arith.addf %21, %28 : vector<4x256xf32>
    %c15_i32 = arith.constant 15 : i32
    %30 = tpu.dynamic_rotate %7 by %c15_i32 dim 1 : vector<4x256xf32>, i32 -> vector<4x256xf32>
    %31 = vector.extract_strided_slice %10 {offsets = [2, 0], sizes = [1, 256], strides = [1, 1]} : vector<8x256xf32> to vector<1x256xf32>
    %32 = vector.broadcast %31 : vector<1x256xf32> to vector<4x256xf32>
    %33 = arith.mulf %30, %32 : vector<4x256xf32>
    %34 = vector.extract_strided_slice %9 {offsets = [0, 2], sizes = [4, 1], strides = [1, 1]} : vector<4x9xf32> to vector<4x1xf32>
    %35 = vector.broadcast %34 : vector<4x1xf32> to vector<4x256xf32>
    %36 = arith.mulf %33, %35 : vector<4x256xf32>
    %37 = arith.addf %29, %36 : vector<4x256xf32>
    %c1_i32 = arith.constant 1 : i32
    %38 = tpu.dynamic_rotate %7 by %c1_i32 dim 1 : vector<4x256xf32>, i32 -> vector<4x256xf32>
    %39 = vector.extract_strided_slice %10 {offsets = [3, 0], sizes = [1, 256], strides = [1, 1]} : vector<8x256xf32> to vector<1x256xf32>
    %40 = vector.broadcast %39 : vector<1x256xf32> to vector<4x256xf32>
    %41 = arith.mulf %38, %40 : vector<4x256xf32>
    %42 = vector.extract_strided_slice %9 {offsets = [0, 3], sizes = [4, 1], strides = [1, 1]} : vector<4x9xf32> to vector<4x1xf32>
    %43 = vector.broadcast %42 : vector<4x1xf32> to vector<4x256xf32>
    %44 = arith.mulf %41, %43 : vector<4x256xf32>
    %45 = arith.addf %37, %44 : vector<4x256xf32>
    %c255_i32 = arith.constant 255 : i32
    %46 = tpu.dynamic_rotate %7 by %c255_i32 dim 1 : vector<4x256xf32>, i32 -> vector<4x256xf32>
    %47 = vector.extract_strided_slice %10 {offsets = [4, 0], sizes = [1, 256], strides = [1, 1]} : vector<8x256xf32> to vector<1x256xf32>
    %48 = vector.broadcast %47 : vector<1x256xf32> to vector<4x256xf32>
    %49 = arith.mulf %46, %48 : vector<4x256xf32>
    %50 = vector.extract_strided_slice %9 {offsets = [0, 5], sizes = [4, 1], strides = [1, 1]} : vector<4x9xf32> to vector<4x1xf32>
    %51 = vector.broadcast %50 : vector<4x1xf32> to vector<4x256xf32>
    %52 = arith.mulf %49, %51 : vector<4x256xf32>
    %53 = arith.addf %45, %52 : vector<4x256xf32>
    %c241_i32 = arith.constant 241 : i32
    %54 = tpu.dynamic_rotate %7 by %c241_i32 dim 1 : vector<4x256xf32>, i32 -> vector<4x256xf32>
    %55 = vector.extract_strided_slice %10 {offsets = [5, 0], sizes = [1, 256], strides = [1, 1]} : vector<8x256xf32> to vector<1x256xf32>
    %56 = vector.broadcast %55 : vector<1x256xf32> to vector<4x256xf32>
    %57 = arith.mulf %54, %56 : vector<4x256xf32>
    %58 = vector.extract_strided_slice %9 {offsets = [0, 6], sizes = [4, 1], strides = [1, 1]} : vector<4x9xf32> to vector<4x1xf32>
    %59 = vector.broadcast %58 : vector<4x1xf32> to vector<4x256xf32>
    %60 = arith.mulf %57, %59 : vector<4x256xf32>
    %61 = arith.addf %53, %60 : vector<4x256xf32>
    %c240_i32 = arith.constant 240 : i32
    %62 = tpu.dynamic_rotate %7 by %c240_i32 dim 1 : vector<4x256xf32>, i32 -> vector<4x256xf32>
    %63 = vector.extract_strided_slice %10 {offsets = [6, 0], sizes = [1, 256], strides = [1, 1]} : vector<8x256xf32> to vector<1x256xf32>
    %64 = vector.broadcast %63 : vector<1x256xf32> to vector<4x256xf32>
    %65 = arith.mulf %62, %64 : vector<4x256xf32>
    %66 = vector.extract_strided_slice %9 {offsets = [0, 7], sizes = [4, 1], strides = [1, 1]} : vector<4x9xf32> to vector<4x1xf32>
    %67 = vector.broadcast %66 : vector<4x1xf32> to vector<4x256xf32>
    %68 = arith.mulf %65, %67 : vector<4x256xf32>
    %69 = arith.addf %61, %68 : vector<4x256xf32>
    %c239_i32 = arith.constant 239 : i32
    %70 = tpu.dynamic_rotate %7 by %c239_i32 dim 1 : vector<4x256xf32>, i32 -> vector<4x256xf32>
    %71 = vector.extract_strided_slice %10 {offsets = [7, 0], sizes = [1, 256], strides = [1, 1]} : vector<8x256xf32> to vector<1x256xf32>
    %72 = vector.broadcast %71 : vector<1x256xf32> to vector<4x256xf32>
    %73 = arith.mulf %70, %72 : vector<4x256xf32>
    %74 = vector.extract_strided_slice %9 {offsets = [0, 8], sizes = [4, 1], strides = [1, 1]} : vector<4x9xf32> to vector<4x1xf32>
    %75 = vector.broadcast %74 : vector<4x1xf32> to vector<4x256xf32>
    %76 = arith.mulf %73, %75 : vector<4x256xf32>
    %77 = arith.addf %69, %76 : vector<4x256xf32>
    %c0_12 = arith.constant 0 : index
    %c0_13 = arith.constant 0 : index
    %78 = vector.load %arg5[%c0_12, %c0_13] : memref<4x1xf32, #tpu.memory_space<vmem>>, vector<4x1xf32>
    %79 = vector.broadcast %78 : vector<4x1xf32> to vector<4x256xf32>
    %80 = arith.addf %77, %79 : vector<4x256xf32>
    %cst_14 = arith.constant 0.000000e+00 : f32
    %81 = vector.broadcast %cst_14 : f32 to vector<4x256xf32>
    %82 = arith.maximumf %80, %81 : vector<4x256xf32>
    %c4 = arith.constant 4 : index
    %c0_15 = arith.constant 0 : index
    %83 = vector.load %arg7[%c4, %c0_15] : memref<8x256xf32, #tpu.memory_space<vmem>>, vector<4x256xf32>
    tpu.vector_store %arg7[%c4, %c0_15], %82 {strides = array<i32>} : memref<8x256xf32, #tpu.memory_space<vmem>>, vector<4x256xf32>,
    return
  }
  func.func @transform_0(%arg0: i32) -> (i32, i32) {
    %c0_i32 = arith.constant 0 : i32
    %c0_i32_0 = arith.constant 0 : i32
    return %c0_i32, %arg0 : i32, i32
  }
  func.func @transform_1(%arg0: i32) -> (i32, i32) {
    %c0_i32 = arith.constant 0 : i32
    %c0_i32_0 = arith.constant 0 : i32
    %c0_i32_1 = arith.constant 0 : i32
    return %c0_i32, %c0_i32_0 : i32, i32
  }
  func.func @transform_2(%arg0: i32) -> (i32, i32) {
    %c0_i32 = arith.constant 0 : i32
    %c0_i32_0 = arith.constant 0 : i32
    %c0_i32_1 = arith.constant 0 : i32
    return %c0_i32, %c0_i32_0 : i32, i32
  }
  func.func @transform_3(%arg0: i32) -> (i32, i32) {
    %c0_i32 = arith.constant 0 : i32
    %c0_i32_0 = arith.constant 0 : i32
    %c0_i32_1 = arith.constant 0 : i32
    return %c0_i32, %c0_i32_0 : i32, i32
  }
  func.func @transform_4(%arg0: i32) -> (i32, i32) {
    %c0_i32 = arith.constant 0 : i32
    %c0_i32_0 = arith.constant 0 : i32
    %c0_i32_1 = arith.constant 0 : i32
    return %c0_i32, %c0_i32_0 : i32, i32
  }
  func.func @transform_5(%arg0: i32) -> (i32, i32) {
    %c0_i32 = arith.constant 0 : i32
    %c0_i32_0 = arith.constant 0 : i32
    %c0_i32_1 = arith.constant 0 : i32
    return %c0_i32, %c0_i32_0 : i32, i32
  }
  func.func @transform_6(%arg0: i32) -> (i32, i32) {
    %c0_i32 = arith.constant 0 : i32
    %c0_i32_0 = arith.constant 0 : i32
    return %c0_i32, %arg0 : i32, i32
  }
}

</mosaic_0001>

<bundles_post_ra>
// kernel: tpu_custom_call.1
= control target key start
LH: loop header
LB: loop body
LE: loop exit
PB: predicated region body
PF: predicated region fallthrough
CT: control target
= control target key end

     0   :  { %s1266_s0 = inlined_call_operand.hbm [shape: bf16[4,512], index: 0, kind: input, shape index: {}]   ;;  %s1267_s1 = inlined_call_operand.vmem [shape: bf16[4,4], index: 1, kind: input, shape index: {}]   ;;  %s1268_s2 = inlined_call_operand.vmem [shape: f32[4,1], index: 2, kind: input, shape index: {}]   ;;  %s1269_s3 = inlined_call_operand.hbm [shape: f32[4,9], index: 3, kind: input, shape index: {}]   ;;  %s1270_s4 = inlined_call_operand.vmem [shape: f32[4,1], index: 4, kind: input, shape index: {}]   ;;  %s1271_s5 = inlined_call_operand.vmem [shape: f32[8,256], index: 5, kind: input, shape index: {}]   ;;  %s1272_s6 = inlined_call_operand.hbm [shape: f32[8,512], index: 6, kind: output, shape index: {}]  }
   0x1   :  { %1277 = sst [smem:[#allocation11_spill]] %s1269_s3 }
   0x2   :  { %11 = vsyncpa [#allocation3], 0 }
   0x3   :  { %13 = vsyncpa [#allocation3 + $0x1], 0 }
   0x4   :  { %14 = vsyncpa [#allocation6], 0 }
   0x5   :  { %15 = vsyncpa [#allocation4], 0 }
   0x6   :  { %17 = vsyncpa [#allocation4 + $0x1], 0  ;;  %s967_s21 = smov 0   ;;  %s969_s22 = smov 0  }
   0x7   :  { %s971_s23 = smov 0   ;;  %s973_s24 = smov 0  }
   0x8 LB: > { %s988_s25 = sadd.s32 4294967295, %s910_s24   ;;  %s682_s26 = sadd.s32 4294967294, %s910_s24   ;;  %s910_s24 = sphi %s973_s24, %s1297_s24   ;;  %s906_s23 = sphi %s971_s23, %s1296_s23   ;;  %s902_s22 = sphi %s969_s22, %s1295_s22   ;;  %s898_s21 = sphi %s967_s21, %s1294_s21  }
   0x9   : > { %p43_p0 = scmp.ne.s32.totalorder %s902_s22, %s898_s21  ;;  %p1273_p1 = scmp.eq.s32.totalorder %s988_s25, 0 }
   0xa   : > { %p178_p3 = scmp.eq.s32.totalorder %s682_s26, 1  ;;  %p683_p5 = scmp.ge.s32.totalorder %s910_s24, 1 }
   0xb   : > { %p997_p4 = por %p1273_p1, %p43_p0  ;;  %p185_p7 = scmp.lt.s32.totalorder %s910_s24, 3 }
   0xc   : > { %p1002_p6 = por %p178_p3, %p43_p0  ;;  %s912_s30 = smov [#allocation5]  }
   0xd   : > { %s1278_s27 = scalar_select %p997_p4, 1, 0 }
   0xe   : > { %s1279_s28 = scalar_select %p1002_p6, 1, 0 }
   0xf   : > { %p1007_p8 = pnand %p683_p5, %p185_p7  ;;  %s204_s7 = sshll.u32 %s912_s30, 4  ;;  %s205_s7 = int_to_ptr.vmem [resolvable:$true] %s204_s7 }
  0x10   : > { %s1015_s8 = sadd.s32 1, %s910_s24   ;;  %s30_s12 = sadd.s32 1, %s906_s23 }
  0x11   : > { %s1280_s29 = scalar_select %p1007_p8, 1, 0 }
  0x12   : > { %p711_p10 = pneg %p1007_p8  ;;  %s27_s10 = ssub.s32 %s910_s24, %s1015_s8 }
  0x13   : > { %p1025_p12 = scmp.eq.s32.totalorder %s27_s10, 0  ;;  %p37_p13 = scmp.ne.s32.totalorder %s906_s23, %s902_s22 }
  0x14   : > { %p1019_p11 = pnand %p711_p10, %p1273_p1  ;;  %s799_s13 = scalar_lea.vmem %s205_s7, 64 }
  0x15   : > { %p800_p3 = scmp.ne.s32.totalorder %s205_s7, %s799_s13  ;;  %p807_p9 = scmp.lt.s32.totalorder %s205_s7, %s205_s7 }
  0x16   : > { %p790_p0 = pneg %p1019_p11  ;;  %p808_p2 = scmp.lt.s32.totalorder %s799_s13, %s799_s13 }
  0x18   : > { %p802_p5 = pnand %p800_p3, %p790_p0  ;;  %p809_p10 = por %p808_p2, %p807_p9 }
  0x1a   : > { %p803_p7 = pneg %p802_p5 }
  0x1c   : > { %p810_p1 = pnand %p809_p10, %p803_p7 }
  0x1e   : > { %813 = shalt.err (!%p810_p1)
}
  0x1f   : > { %s1283_s3 = sld [smem:[#allocation11_spill]]  ;;  %p38_p1 = scmp.eq.s32.totalorder %s910_s24, 0 }
  0x20   : > { %s1042_s16 = scalar_select %p1025_p12, %s906_s23, %s30_s12  }
  0x21   : > { %p1284_p2 = scmp.eq.s32.totalorder %s988_s25, 1  ;;  %p724_p0 = scmp.lt.s32.totalorder %s910_s24, 2 }
  0x22   : > { %s221_s18 = sand.u32 1, %s906_s23   ;;  %p39_p3 = por %p38_p1, %p37_p13 }
  0x23   : > { %p1050_p9 = por %p1284_p2, %p37_p13  ;;  %s686_s19 = sshll.u32 %s221_s18, 2 }
  0x24   : > { %s701_s20 = sshll.u32 %s910_s24, 6  ;;  %s225_s9 = scalar_lea.vmem [#allocation2], %s686_s19 }
  0x25   : > { %714 = dma.hbm_to_vmem [thread:$0]  (!%p1019_p11), %s1283_s3, 64, %s205_s7, [#allocation6]  }
  0x26   : > { %s1285_s17 = scalar_select %p1050_p9, 1, 0 }
  0x27   : > { %s1063_s7 = scalar_lea.hbm %s1266_s0, %s701_s20  ;;  %s233_s10 = sshll.u32 %s225_s9, 4  ;;  %s234_s10 = int_to_ptr.vmem [resolvable:$true] %s233_s10 }
  0x28   : > { %p1065_p11 = pnand %p724_p0, %p39_p3  ;;  %s222_s12 = scalar_lea.sflag [#allocation3], %s221_s18 }
  0x29   : > { %s814_s13 = scalar_lea.hbm %s1063_s7, 64  ;;  %s819_s20 = scalar_lea.hbm %s1266_s0, 128 }
  0x2a   : > { %p815_p12 = scmp.ne.s32.totalorder %s1063_s7, %s814_s13  ;;  %p816_p13 = pneg %p1065_p11 }
  0x2b   : > { %p820_p10 = scmp.lt.s32.totalorder %s1063_s7, %s1266_s0  ;;  %p821_p1 = scmp.lt.s32.totalorder %s819_s20, %s814_s13 }
  0x2c   : > { %p817_p5 = pnand %p816_p13, %p815_p12 }
  0x2d   : > { %p822_p2 = por %p821_p1, %p820_p10 }
  0x2e   : > { %p818_p7 = pneg %p817_p5 }
  0x30   : > { %p823_p0 = pnand %p822_p2, %p818_p7 }
  0x32   : > { %826 = shalt.err (!%p823_p0)
}
  0x33   : > { %s827_s30 = scalar_lea.vmem %s234_s10, 64  ;;  %s913_s18 = smov [#allocation2]  }
  0x34   : > { %p828_p3 = scmp.ne.s32.totalorder %s234_s10, %s827_s30  ;;  %s832_s9 = sshll.u32 %s913_s18, 4  ;;  %s833_s9 = int_to_ptr.vmem [resolvable:$false] %s832_s9 }
  0x35   : > { %s834_s3 = scalar_lea.vmem %s833_s9, 128  ;;  %p835_p12 = scmp.lt.s32.totalorder %s234_s10, %s833_s9 }
  0x36   : > { %p830_p6 = pnand %p828_p3, %p816_p13  ;;  %p836_p5 = scmp.lt.s32.totalorder %s834_s3, %s827_s30 }
  0x38   : > { %p831_p9 = pneg %p830_p6  ;;  %p837_p4 = por %p836_p5, %p835_p12 }
  0x3a   : > { %p838_p8 = pnand %p837_p4, %p831_p9 }
  0x3c   : > { %841 = shalt.err (!%p838_p8)
}
  0x3d   : > { %718 = dma.hbm_to_vmem [thread:$0]  (!%p1065_p11), %s1063_s7, 64, %s234_s10, %s222_s12  }
  0x3e   : > { %p1287_p7 = scmp.ne.s32.totalorder %s1280_s29, 0 }
  0x3f   : > { %s1086_s13 = sand.u32 (!%p1287_p7), 1, %s902_s22   ;;  %p1288_p6 = scmp.ne.s32.totalorder (!%p1287_p7), %s1278_s27, 0 }
  0x40   : > { %242 = sbr.rel (%p1287_p7) target bundleno = 478 (0x1de), region = 44  ;;  %s690_s14 = sshll.u32 (!%p1287_p7), %s1086_s13, 2 }
  0x41   : > { %s245_s15 = scalar_lea.sflag (!%p1287_p7), [#allocation3], %s1086_s13  ;;  %s248_s20 = scalar_lea.vmem (!%p1287_p7), [#allocation2], %s690_s14 }
  0x45   : > { %885 = dma.done.wait (%p1288_p6), %s245_s15, 64  }
  0x46   : > { %887 = vsyncadd (%p1288_p6), %s245_s15, 4294967232  ;;  %p1289_p4 = scmp.eq.s32.totalorder %s988_s25, 0 }
  0x48   : > { %889 = dma.done.wait (%p1289_p4), [#allocation6], 64   ;;  %p1290_p8 = pmov %p1289_p4 }
  0x49   : > { %v914_v0 = vmov 0   ;;  %vm305_vm0 = vcmask 1041408   ;;  %v693_v1 = vld.sshfl [vmem:[%s248_s20] sm:$0x33 pattern:$0x76325410]  ;;  %v371_v35 = vlaneseq }
  0x4a   : > { %891 = vsyncadd (%p1290_p8), [#allocation6], 4294967232  ;;  %344 = vmatprep.mubr.bf16.mxu0 %v914_v0  ;;  %777 = vset.pattern.permute.xlu0 %v914_v0  ;;  %v300_v2 = vcombine.high %v693_v1, %v693_v1  ;;  %v307_v3 = vsel %vm305_vm0, %v693_v1, 0  ;;  %v286_v4 = vld [vmem:[%s1268_s2] sm:$0xf]  ;;  %vm301_vm1 = vcmask 31744  }
  0x4b   : > { %779 = vset.pattern.permute.xlu1 %v914_v0  ;;  %v357_v5 = vld [vmem:[#allocation5] sm:$0xf]  ;;  %289 = vperm.xlu0 %777, %v286_v4   ;;  %v284_v6 = vld [vmem:[%s1267_s1] sm:$0x3]  ;;  %v915_v7 = vmov 4   ;;  %v916_v8 = vmov 1  }
  0x4c   : > { %387 = vperm.xlu1 %779, %v357_v5   ;;  %694 = vmatprep.subr.msk.bf16.mxu0 %vm305_vm0, %v300_v2  ;;  %v917_v9 = vmov 2   ;;  %v918_v10 = vmov 3   ;;  %v919_v11 = vmov 5   ;;  %v920_v12 = vmov 6   ;;  %v569_v15 = vld [vmem:[%s1270_s4] sm:$0xf] }
  0x4d   : > { %327 = vmatpush1.bf16.msra.mxu0 %v307_v3  ;;  %v921_v13 = vmov 7   ;;  %v922_v14 = vmov 8   ;;  %s692_s12 = sshll.u32 %s1086_s13, 4  ;;  %s923_s26 = smov 17   ;;  %v1144_v38 = vshrl.u32 %v371_v35, 7  ;;  %v1146_v39 = vand.u32 127, %v371_v35 }
  0x4e   : > { %s1113_s19 = scalar_lea.vmem [#allocation7], %s692_s12  ;;  %s924_s30 = smov 16   ;;  %v1152_v42 = vld [vmem:[%s1271_s5] sm:$0xff]  ;;  %v1157_v43 = vld [vmem:[%s1271_s5 + $0x8] sm:$0xff] }
  0x4f   : > { %778 = vset.pattern.permute.xlu0 %v915_v7  ;;  %s925_s18 = smov 15   ;;  %s926_s9 = smov 1   ;;  %v378_v41 = vsub.s32 0, %v1144_v38  ;;  %vm373_vm2 = vcmp.lt.s32.totalorder %v1146_v39, 17  ;;  %v403_v45 = vsub.s32 1, %v1144_v38  ;;  %vm398_vm3 = vcmp.lt.s32.totalorder %v1146_v39, 16 }
  0x50   : > { %695 = vmatmul.mubr.msk.bf16.vlgmr.msra.gmra.mxu0 %vm301_vm1, %v284_v6  ;;  %362 = vperm.xlu0 %778, %v357_v5   ;;  %s927_s14 = smov 127   ;;  %s928_s15 = smov 113   ;;  %v428_v49 = vsub.s32 2, %v1144_v38  ;;  %vm423_vm4 = vcmp.lt.s32.totalorder %v1146_v39, 15  ;;  %v453_v57 = vsub.s32 3, %v1144_v38  ;;  %vm448_vm5 = vcmp.lt.s32.totalorder %v1146_v39, 1 }
  0x51   : > { %s929_s20 = smov 112   ;;  %s930_s3 = smov 111   ;;  %v379_v47 = vrot.slane %v1152_v42, %v378_v41  ;;  %v383_v48 = vrot.slane %v1157_v43, %v378_v41  ;;  %v404_v52 = vrot.slane %v1152_v42, %v403_v45  ;;  %v408_v53 = vrot.slane %v1157_v43, %v403_v45 }
  0x52   : > { %v429_v62 = vrot.slane %v1152_v42, %v428_v49  ;;  %v433_v63 = vrot.slane %v1157_v43, %v428_v49  ;;  %v503_v1 = vsub.s32 5, %v1144_v38  ;;  %vm473_vm6 = vcmp.lt.s32.totalorder %v1146_v39, 127  ;;  %s702_s11 = sshll.u32 %s988_s25, 8  ;;  %s602_s12 = sshll.u32 %s1113_s19, 4  ;;  %s603_s12 = int_to_ptr.vmem [resolvable:$true] %s602_s12 }
  0x53   : > { %vm498_vm7 = vcmp.lt.s32.totalorder %v1146_v39, 113  ;;  %vm523_vm8 = vcmp.lt.s32.totalorder %v1146_v39, 112  ;;  %vm548_vm9 = vcmp.lt.s32.totalorder %v1146_v39, 111  ;;  %p1291_p11 = scmp.ne.s32.totalorder %s1285_s17, 0  ;;  %s931_s25 = smov [#allocation7]  }
  0x54   : > { %780 = vset.pattern.permute.xlu0 %v916_v8  ;;  %v454_v8 = vrot.slane %v1152_v42, %v453_v57 }
  0x55   : > { %412 = vperm.xlu0 %780, %v357_v5  }
  0x59   : > { %781 = vset.pattern.permute.xlu0 %v917_v9  ;;  %v458_v9 = vrot.slane %v1157_v43, %v453_v57 }
  0x5a   : > { %437 = vperm.xlu0 %781, %v357_v5  }
  0x5e   : > { %782 = vset.pattern.permute.xlu0 %v918_v10 }
  0x5f   : > { %462 = vperm.xlu0 %782, %v357_v5  }
  0x63   : > { %783 = vset.pattern.permute.xlu0 %v919_v11 }
  0x64   : > { %487 = vperm.xlu0 %783, %v357_v5  }
  0x68   : > { %784 = vset.pattern.permute.xlu0 %v920_v12 }
  0x69   : > { %512 = vperm.xlu0 %784, %v357_v5  }
  0x6d   : > { %785 = vset.pattern.permute.xlu0 %v921_v13 }
  0x6e   : > { %537 = vperm.xlu0 %785, %v357_v5  }
  0x72   : > { %786 = vset.pattern.permute.xlu0 %v922_v14 }
  0x73   : > { %562 = vperm.xlu0 %786, %v357_v5  }
  0x77   : > { %787 = vset.pattern.permute.xlu0 %v914_v0  ;;  %v478_v0 = vsub.s32 4, %v1144_v38 }
  0x78   : > { %572 = vperm.xlu0 %787, %v569_v15  }
  0xc6   : > { %v290_v16 = vpop.permute.xlu0 %289 }
  0xc7   : > { %v388_v25 = vpop.permute.xlu1 %387 }
  0xcb   : > { %v363_v31 = vpop.permute.xlu0 %362 }
  0xd0   : > { %v413_v33 = vpop.permute.xlu0 %412 }
  0xd5   : > { %v1142_v37 = vpop.permute.xlu0 %437 }
  0xda   : > { %v1159_v44 = vpop.permute.xlu0 %462 }
  0xdf   : > { %v488_v58 = vpop.permute.xlu0 %487 }
 0x110   : > { %v346_v17 = vpop.f32.mrf.mxu0 }
 0x111   : > { %v347_v18 = vadd.f32 %v346_v17, %v290_v16  ;;  %v483_v17 = vrot.slane %v1157_v43, %v478_v0 }
 0x112   : > { %v348_v19 = vpop.f32.mrf.mxu0 }
 0x113   : > { %v1108_v20 = vmax.f32 %v347_v18, 0.0  ;;  %v349_v21 = vadd.f32 %v348_v19, %v290_v16  ;;  %v479_v16 = vrot.slane %v1152_v42, %v478_v0  ;;  %v513_v18 = vpop.permute.xlu0 %512 }
 0x114   : > { %v350_v22 = vpop.f32.mrf.mxu0 }
 0x115   : > { %v1110_v23 = vmax.f32 %v349_v21, 0.0  ;;  %367 = vrot.lane.b32.xlu1 %v1108_v20, %s923_s26  ;;  %355 = vst [vmem:[%s1113_s19] sm:$0xf] %v1108_v20  ;;  %v365_v59 = vmul.f32 %v363_v31, %v1108_v20  ;;  %v504_v22 = vrot.slane %v1152_v42, %v503_v1 }
 0x116   : > { %v351_v24 = vpop.f32.mrf.mxu0 }
 0x117   : > { %356 = vst [vmem:[%s1113_s19 + $0x8] sm:$0xf] %v1110_v23  ;;  %v366_v7 = vmul.f32 %v363_v31, %v1110_v23  ;;  %v528_v31 = vsub.s32 6, %v1144_v38 }
 0x119   : > { %394 = vrot.lane.b32.xlu1 %v1108_v20, %s924_s30 }
 0x11d   : > { %419 = vrot.lane.b32.xlu1 %v1108_v20, %s925_s18 }
 0x121   : > { %444 = vrot.lane.b32.xlu1 %v1108_v20, %s926_s9 }
 0x125   : > { %469 = vrot.lane.b32.xlu1 %v1108_v20, %s927_s14 }
 0x129   : > { %494 = vrot.lane.b32.xlu1 %v1108_v20, %s928_s15 }
 0x12d   : > { %519 = vrot.lane.b32.xlu1 %v1108_v20, %s929_s20 }
 0x131   : > { %544 = vrot.lane.b32.xlu1 %v1108_v20, %s930_s3 }
 0x135   : > { %369 = vrot.lane.b32.xlu1 %v1110_v23, %s923_s26 }
 0x139   : > { %396 = vrot.lane.b32.xlu1 %v1110_v23, %s924_s30 }
 0x13d   : > { %421 = vrot.lane.b32.xlu1 %v1110_v23, %s925_s18  ;;  %s1227_s18 = scalar_lea.hbm %s1272_s6, %s702_s11 }
 0x141   : > { %446 = vrot.lane.b32.xlu1 %v1110_v23, %s926_s9  ;;  %s588_s9 = scalar_lea.sflag [#allocation4], %s1086_s13 }
 0x145   : > { %471 = vrot.lane.b32.xlu1 %v1110_v23, %s927_s14  ;;  %s842_s14 = scalar_lea.vmem %s603_s12, 256 }
 0x146   : > { %p843_p9 = scmp.ne.s32.totalorder %s603_s12, %s842_s14 }
 0x148   : > { %p844_p13 = pnand %p843_p9, %p1291_p11 }
 0x149   : > { %496 = vrot.lane.b32.xlu1 %v1110_v23, %s928_s15  ;;  %s846_s15 = sshll.u32 %s931_s25, 4  ;;  %s847_s15 = int_to_ptr.vmem [resolvable:$false] %s846_s15 }
 0x14a   : > { %p845_p10 = pneg %p844_p13  ;;  %p849_p1 = scmp.lt.s32.totalorder %s603_s12, %s847_s15 }
 0x14d   : > { %521 = vrot.lane.b32.xlu1 %v1110_v23, %s929_s20  ;;  %s848_s20 = scalar_lea.vmem %s847_s15, 512 }
 0x14e   : > { %p850_p2 = scmp.lt.s32.totalorder %s848_s20, %s842_s14 }
 0x150   : > { %p851_p0 = por %p850_p2, %p849_p1 }
 0x151   : > { %546 = vrot.lane.b32.xlu1 %v1110_v23, %s930_s3 }
 0x152   : > { %p852_p3 = pnand %p851_p0, %p845_p10 }
 0x187   : > { %v368_v26 = vpop.permute.xlu1 %367 }
 0x18b   : > { %v395_v27 = vpop.permute.xlu1 %394 }
 0x18f   : > { %v420_v28 = vpop.permute.xlu1 %419 }
 0x193   : > { %v445_v29 = vpop.permute.xlu1 %444 }
 0x197   : > { %v1134_v30 = vpop.permute.xlu1 %469 }
 0x19b   : > { %v1136_v32 = vpop.permute.xlu1 %494 }
 0x19f   : > { %v1138_v34 = vpop.permute.xlu1 %519 }
 0x1a3   : > { %v1140_v36 = vpop.permute.xlu1 %544 }
 0x1a7   : > { %v370_v40 = vpop.permute.xlu1 %369 }
 0x1a8   : > { %v374_v50 = vsel %vm373_vm2, %v368_v26, %v370_v40  ;;  %v375_v51 = vsel %vm373_vm2, %v370_v40, %v368_v26  ;;  %v553_v40 = vsub.s32 7, %v1144_v38 }
 0x1a9   : > { %v384_v60 = vmul.f32 %v379_v47, %v375_v51  ;;  %v385_v61 = vmul.f32 %v383_v48, %v374_v50  ;;  %v538_v51 = vpop.permute.xlu0 %537 }
 0x1ab   : > { %v397_v46 = vpop.permute.xlu1 %396  ;;  %v390_v10 = vmul.f32 %v388_v25, %v384_v60  ;;  %v391_v11 = vmul.f32 %v388_v25, %v385_v61  ;;  %v554_v60 = vrot.slane %v1152_v42, %v553_v40  ;;  %v558_v61 = vrot.slane %v1157_v43, %v553_v40 }
 0x1ac   : > { %v399_v55 = vsel %vm398_vm3, %v395_v27, %v397_v46  ;;  %v400_v56 = vsel %vm398_vm3, %v397_v46, %v395_v27 }
 0x1ad   : > { %v409_v2 = vmul.f32 %v404_v52, %v400_v56  ;;  %v410_v3 = vmul.f32 %v408_v53, %v399_v55  ;;  %v392_v27 = vadd.f32 %v390_v10, %v365_v59  ;;  %v529_v53 = vrot.slane %v1152_v42, %v528_v31 }
 0x1af   : > { %v422_v54 = vpop.permute.xlu1 %421  ;;  %v415_v19 = vmul.f32 %v413_v33, %v409_v2  ;;  %v416_v20 = vmul.f32 %v413_v33, %v410_v3 }
 0x1b0   : > { %v424_v4 = vsel %vm423_vm4, %v420_v28, %v422_v54  ;;  %v425_v5 = vsel %vm423_vm4, %v422_v54, %v420_v28  ;;  %v393_v28 = vadd.f32 %v391_v11, %v366_v7  ;;  %v533_v54 = vrot.slane %v1157_v43, %v528_v31 }
 0x1b1   : > { %v434_v14 = vmul.f32 %v429_v62, %v425_v5  ;;  %v435_v15 = vmul.f32 %v433_v63, %v424_v4  ;;  %v417_v41 = vadd.f32 %v415_v19, %v392_v27 }
 0x1b2   : > { %v418_v45 = vadd.f32 %v416_v20, %v393_v28 }
 0x1b3   : > { %v447_v6 = vpop.permute.xlu1 %446  ;;  %v440_v33 = vmul.f32 %v1142_v37, %v434_v14  ;;  %v441_v35 = vmul.f32 %v1142_v37, %v435_v15 }
 0x1b4   : > { %v449_v12 = vsel %vm448_vm5, %v445_v29, %v447_v6  ;;  %v450_v13 = vsel %vm448_vm5, %v447_v6, %v445_v29  ;;  %v508_v29 = vrot.slane %v1157_v43, %v503_v1 }
 0x1b5   : > { %v459_v23 = vmul.f32 %v454_v8, %v450_v13  ;;  %v460_v24 = vmul.f32 %v458_v9, %v449_v12  ;;  %v442_v55 = vadd.f32 %v440_v33, %v417_v41  ;;  %v443_v56 = vadd.f32 %v441_v35, %v418_v45 }
 0x1b7   : > { %v472_v21 = vpop.permute.xlu1 %471  ;;  %v466_v49 = vmul.f32 %v1159_v44, %v460_v24 }
 0x1b8   : > { %v474_v25 = vsel %vm473_vm6, %v1134_v30, %v472_v21  ;;  %v475_v26 = vsel %vm473_vm6, %v472_v21, %v1134_v30  ;;  %v465_v30 = vmul.f32 %v1159_v44, %v459_v23 }
 0x1b9   : > { %v484_v46 = vmul.f32 %v479_v16, %v474_v25  ;;  %v485_v47 = vmul.f32 %v483_v17, %v475_v26 }
 0x1ba   : > { %v467_v62 = vadd.f32 %v465_v30, %v442_v55 }
 0x1bb   : > { %v497_v48 = vpop.permute.xlu1 %496  ;;  %v490_v44 = vmul.f32 %v488_v58, %v484_v46  ;;  %v491_v57 = vmul.f32 %v488_v58, %v485_v47  ;;  %v563_v58 = vpop.permute.xlu0 %562 }
 0x1bc   : > { %v499_v50 = vsel %vm498_vm7, %v1136_v32, %v497_v48  ;;  %v500_v37 = vsel %vm498_vm7, %v497_v48, %v1136_v32  ;;  %v468_v32 = vadd.f32 %v466_v49, %v443_v56 }
 0x1bd   : > { %v509_v52 = vmul.f32 %v504_v22, %v499_v50  ;;  %v510_v38 = vmul.f32 %v508_v29, %v500_v37  ;;  %v492_v5 = vadd.f32 %v490_v44, %v467_v62 }
 0x1be   : > { %v493_v6 = vadd.f32 %v491_v57, %v468_v32 }
 0x1bf   : > { %v522_v59 = vpop.permute.xlu1 %521  ;;  %v515_v1 = vmul.f32 %v513_v18, %v509_v52  ;;  %v516_v2 = vmul.f32 %v513_v18, %v510_v38  ;;  %v573_v17 = vpop.permute.xlu0 %572 }
 0x1c0   : > { %v524_v63 = vsel %vm523_vm8, %v1138_v34, %v522_v59  ;;  %v525_v0 = vsel %vm523_vm8, %v522_v59, %v1138_v34 }
 0x1c1   : > { %v534_v3 = vmul.f32 %v529_v53, %v524_v63  ;;  %v535_v4 = vmul.f32 %v533_v54, %v525_v0  ;;  %v517_v9 = vadd.f32 %v515_v1, %v492_v5  ;;  %v518_v10 = vadd.f32 %v516_v2, %v493_v6 }
 0x1c3   : > { %v540_v42 = vmul.f32 %v538_v51, %v534_v3  ;;  %v541_v7 = vmul.f32 %v538_v51, %v535_v4  ;;  %v547_v43 = vpop.permute.xlu1 %546 }
 0x1c4   : > { %v549_v8 = vsel %vm548_vm9, %v1140_v36, %v547_v43  ;;  %v550_v34 = vsel %vm548_vm9, %v547_v43, %v1140_v36 }
 0x1c5   : > { %v559_v11 = vmul.f32 %v554_v60, %v549_v8  ;;  %v560_v12 = vmul.f32 %v558_v61, %v550_v34  ;;  %v542_v13 = vadd.f32 %v540_v42, %v517_v9  ;;  %v543_v14 = vadd.f32 %v541_v7, %v518_v10 }
 0x1c7   : > { %v565_v15 = vmul.f32 %v563_v58, %v559_v11  ;;  %v566_v16 = vmul.f32 %v563_v58, %v560_v12 }
 0x1c9   : > { %v567_v18 = vadd.f32 %v565_v15, %v542_v13  ;;  %v568_v19 = vadd.f32 %v566_v16, %v543_v14 }
 0x1cb   : > { %v575_v20 = vadd.f32 %v573_v17, %v567_v18  ;;  %v576_v21 = vadd.f32 %v573_v17, %v568_v19 }
 0x1cd   : > { %v577_v36 = vmax.f32 %v575_v20, 0.0  ;;  %v578_v39 = vmax.f32 %v576_v21, 0.0 }
 0x1cf   : > { %v581_v22 = vrot.slane %v577_v36, 4  ;;  %v582_v23 = vrot.slane %v578_v39, 4 }
 0x1d1   : > { %585 = vst [vmem:[%s1113_s19] sm:$0xf0] %v581_v22  ;;  %586 = vst [vmem:[%s1113_s19 + $0x8] sm:$0xf0] %v582_v23 }
 0x1d2   : > { %855 = shalt.err (!%p852_p3)
}
 0x1d3   : > { %s856_s19 = scalar_lea.hbm %s1227_s18, 256  ;;  %s860_s29 = scalar_lea.hbm %s1272_s6, 512 }
 0x1d4   : > { %p857_p12 = scmp.ne.s32.totalorder %s1227_s18, %s856_s19  ;;  %p861_p6 = scmp.lt.s32.totalorder %s1227_s18, %s1272_s6 }
 0x1d5   : > { %p862_p4 = scmp.lt.s32.totalorder %s860_s29, %s856_s19 }
 0x1d6   : > { %p858_p5 = pnand %p857_p12, %p1291_p11 }
 0x1d7   : > { %p863_p8 = por %p862_p4, %p861_p6 }
 0x1d8   : > { %p859_p7 = pneg %p858_p5 }
 0x1da   : > { %p864_p9 = pnand %p863_p8, %p859_p7 }
 0x1dc   : > { %867 = shalt.err (!%p864_p9)
}
 0x1dd   : > { %709 = dma.vmem_to_hbm [thread:$0]  (%p1291_p11), %s603_s12, 256, %s1227_s18, %s588_s9  }
 0x1de PF: > { %s614_s10 = sand.u32 1, %s898_s21   ;;  %p1292_p13 = scmp.ne.s32.totalorder %s1279_s28, 0 }
 0x1df   : > { %p1293_p10 = scmp.ge.s32.totalorder %s910_s24, 2  ;;  %s615_s11 = scalar_lea.sflag [#allocation4], %s614_s10 }
 0x1e1   : > { %p720_p1 = pnand %p1293_p10, %p1292_p13 }
 0x1e3   : > { %p721_p2 = pneg %p720_p1 }
 0x1e5   : > { %893 = dma.done.wait (%p721_p2), %s615_s11, 256  }
 0x1e6   : > { %895 = vsyncadd (%p721_p2), %s615_s11, 4294967040  ;;  %p20_p0 = scmp.ge.s32.totalorder %s1015_s8, 4   ;;  %s1294_s21 = smov %s902_s22 }
 0x1e7   : > { %s1295_s22 = smov %s906_s23  ;;  %s1296_s23 = smov %s1042_s16 }
 0x1e8   : > { %s1297_s24 = smov %s1015_s8  ;;  %22 = sbr.rel (!%p20_p0) target bundleno = 8 (0x8), region = 93 }
 0x1ed   :  { %620 = vsyncpa [#allocation3], 1 }
 0x1ee   :  { %622 = vsyncpa [#allocation3 + $0x1], 1 }
 0x1ef   :  { %623 = vsyncpa [#allocation6], 1 }
 0x1f0   :  { %624 = vsyncpa [#allocation4], 1 }
 0x1f1   :  { %626 = vsyncpa [#allocation4 + $0x1], 1 }

</bundles_post_ra>
